<compile_context>
chip_gen: v5e
topology: v5e:2x2
jax: 0.10.0
libtpu: 0.0.40
codegen_flags: <defaults>
</compile_context>

<pallas_src>
import functools

import jax
import jax.numpy as jnp
from jax.experimental import pallas as pl
from jax.experimental.pallas import tpu as pltpu


def _round_up(n, m):
    return ((n + m - 1) // m) * m


# ----------------------------------------------------------------------------
# Kernel: one (TM, D) batch tile through the whole autoencoder.
# ----------------------------------------------------------------------------
def _autoencoder_kernel(x_ref,
                        w1_ref, b1_ref,
                        w2_ref, b2_ref,
                        w3_ref, b3_ref,
                        w4_ref, b4_ref,
                        out_ref,
                        *, mm_dtype):
    def dense(h, w_ref, b_ref):
        # MXU matmul (optionally bf16 operands) with f32 accumulation,
        # bias-add in f32.
        return jnp.dot(h.astype(mm_dtype), w_ref[...].astype(mm_dtype),
                       preferred_element_type=jnp.float32) + b_ref[...]

    x = x_ref[...]                                          # (TM, D) f32

    # ----- encoder -----
    h = jnp.maximum(dense(x, w1_ref, b1_ref), 0.0)          # (TM, 128)  ReLU
    h = jnp.maximum(dense(h, w2_ref, b2_ref), 0.0)          # (TM, latent) ReLU

    # ----- decoder -----
    h = jnp.maximum(dense(h, w3_ref, b3_ref), 0.0)          # (TM, 128)  ReLU
    logits = dense(h, w4_ref, b4_ref)                       # (TM, D)
    out_ref[...] = jax.nn.sigmoid(logits)                   # exp on the EUP


# ----------------------------------------------------------------------------
# Wrapper: batch tiling + pallas_call (no padding, no extra HBM passes).
# ----------------------------------------------------------------------------
def sensor_autoencoder_forward(x, params, *, tm=1024, bf16_matmul=False):
    """x: (B, seq_len, input_dim) float32. Returns (B, seq_len, input_dim)."""
    B, seq_len, input_dim = x.shape
    D = seq_len * input_dim

    w1, b1, w2, b2, w3, b3, w4, b4 = params
    hidden = w1.shape[1]                                    # 128
    latent = w2.shape[1]                                    # 16
    assert w1.shape == (D, hidden) and w4.shape == (hidden, D)

    x_flat = x.reshape(B, D)                                # no pad, no copy pass

    # Batch tile: as large as requested, but (a) multiple of 8 (sublane), and
    # (b) capped so there are >= 2 grid steps whenever B > 8, letting the
    # "parallel" axis shard across both TensorCores on v7x.  Ragged last block
    # (TM not dividing B) is handled by Pallas's masked writeback.
    TM = max(8, min(tm, _round_up(pl.cdiv(B, 2), 8)))
    grid = (pl.cdiv(B, TM),)

    xo_spec = pl.BlockSpec((TM, D), lambda i: (i, 0))

    def resident(shape):
        # Full-array block, constant index map -> stays resident in VMEM,
        # no per-step re-DMA.  (Buffered(1) would also drop the second buffer,
        # but the ~0.3 MiB saved is immaterial here.)
        return pl.BlockSpec(shape, lambda i: (0, 0))

    flops = 2 * B * (D * hidden + hidden * latent + latent * hidden + hidden * D)
    param_elems = (D * hidden + hidden + hidden * latent + latent
                   + latent * hidden + hidden + hidden * D + D)
    cost = pl.CostEstimate(
        flops=flops,
        transcendentals=B * D,                              # sigmoid exp
        bytes_accessed=4 * (2 * B * D + param_elems),
    )

    kernel = functools.partial(
        _autoencoder_kernel,
        mm_dtype=jnp.bfloat16 if bf16_matmul else jnp.float32)

    recon_flat = pl.pallas_call(
        kernel,
        out_shape=jax.ShapeDtypeStruct((B, D), jnp.float32),
        grid_spec=pltpu.PrefetchScalarGridSpec(
            num_scalar_prefetch=0,
            grid=grid,
            in_specs=[
                xo_spec,
                resident((D, hidden)), resident((1, hidden)),
                resident((hidden, latent)), resident((1, latent)),
                resident((latent, hidden)), resident((1, hidden)),
                resident((hidden, D)), resident((1, D)),
            ],
            out_specs=xo_spec,
        ),
        compiler_params=pltpu.CompilerParams(
            dimension_semantics=("parallel",),              # TC sharding on v7x
            vmem_limit_bytes=32 * 1024 * 1024,              # ample headroom everywhere
        ),
        cost_estimate=cost,
    )(x_flat, w1, b1, w2, b2, w3, b3, w4, b4)

    return recon_flat.reshape(B, seq_len, input_dim)


# ----------------------------------------------------------------------------
# Parameter init (mimics nn.Linear U(-1/sqrt(fan_in), 1/sqrt(fan_in))).
# Weights stored (in_features, out_features); biases (1, out_features).
# ----------------------------------------------------------------------------
def init_params(key, input_dim=3, latent_dim=16, seq_len=50):
    D = input_dim * seq_len
    dims = [(D, 128), (128, latent_dim), (latent_dim, 128), (128, D)]
    params = []
    for (fan_in, fan_out) in dims:
        key, kw, kb = jax.random.split(key, 3)
        bound = 1.0 / jnp.sqrt(fan_in)
        w = jax.random.uniform(kw, (fan_in, fan_out), jnp.float32, -bound, bound)
        b = jax.random.uniform(kb, (1, fan_out), jnp.float32, -bound, bound)
        params.extend([w, b])
    return tuple(params)


def _reference_forward(x, params):
    """Plain-JAX reference for sanity checking."""
    w1, b1, w2, b2, w3, b3, w4, b4 = params
    B = x.shape[0]
    h = x.reshape(B, -1)
    h = jnp.maximum(h @ w1 + b1, 0.0)
    h = jnp.maximum(h @ w2 + b2, 0.0)
    h = jnp.maximum(h @ w3 + b3, 0.0)
    h = jax.nn.sigmoid(h @ w4 + b4)
    return h.reshape(x.shape)


if __name__ == "__main__":
    input_dim, latent_dim, seq_len = 3, 16, 50
    key = jax.random.PRNGKey(0)
    key, kp = jax.random.split(key)
    params = init_params(kp, input_dim, latent_dim, seq_len)

    # --- small batch: single grid step, TM == B ---
    key, kx = jax.random.split(key)
    x_small = jax.random.normal(kx, (8, seq_len, input_dim), jnp.float32)
    recon_small = jax.block_until_ready(sensor_autoencoder_forward(x_small, params))
    ref_small = _reference_forward(x_small, params)
    assert recon_small.shape == x_small.shape
    assert jnp.allclose(recon_small, ref_small, atol=1e-5, rtol=1e-5)

    # --- ragged batch: 2 grid steps, last block partially out of bounds ---
    key, kx2 = jax.random.split(key)
    x_ragged = jax.random.normal(kx2, (300, seq_len, input_dim), jnp.float32)
    recon_ragged = jax.block_until_ready(sensor_autoencoder_forward(x_ragged, params))
    ref_ragged = _reference_forward(x_ragged, params)
    assert recon_ragged.shape == x_ragged.shape
    assert jnp.allclose(recon_ragged, ref_ragged, atol=1e-5, rtol=1e-5)

    # --- bf16 matmul-operand path (v5e MXU); f32 accumulation, looser check ---
    key, kx3 = jax.random.split(key)
    x_bf16 = jax.random.normal(kx3, (64, seq_len, input_dim), jnp.float32)
    recon_bf16 = jax.block_until_ready(
        sensor_autoencoder_forward(x_bf16, params, bf16_matmul=True))
    ref_bf16 = _reference_forward(x_bf16, params)
    assert recon_bf16.shape == x_bf16.shape
    assert jnp.allclose(recon_bf16, ref_bf16, atol=5e-2, rtol=5e-2)

    print("KERNEL_OK")
</pallas_src>

<mosaic_0001>
module attributes {stable_mosaic.version = 11 : i64} {
  func.func @_autoencoder_kernel(%arg0: i32, %arg1: memref<8x150xf32, #tpu.memory_space<vmem>>, %arg2: memref<150x128xf32, #tpu.memory_space<vmem>>, %arg3: memref<1x128xf32, #tpu.memory_space<vmem>>, %arg4: memref<128x16xf32, #tpu.memory_space<vmem>>, %arg5: memref<1x16xf32, #tpu.memory_space<vmem>>, %arg6: memref<16x128xf32, #tpu.memory_space<vmem>>, %arg7: memref<1x128xf32, #tpu.memory_space<vmem>>, %arg8: memref<128x150xf32, #tpu.memory_space<vmem>>, %arg9: memref<1x150xf32, #tpu.memory_space<vmem>>, %arg10: memref<8x150xf32, #tpu.memory_space<vmem>>) attributes {dimension_semantics = [#tpu.dimension_semantics<parallel>], iteration_bounds = array<i64: 1>, scalar_prefetch = 0 : i64, scratch_operands = 0 : i64, tpu.core_type = #tpu.core_type<tc>, window_params = [{transform_indices = @transform_0, window_bounds = array<i64: 8, 150>}, {pipeline_mode = #tpu.pipeline_mode<synchronous>, transform_indices = @transform_1, window_bounds = array<i64: 150, 128>}, {pipeline_mode = #tpu.pipeline_mode<synchronous>, transform_indices = @transform_2, window_bounds = array<i64: 1, 128>}, {pipeline_mode = #tpu.pipeline_mode<synchronous>, transform_indices = @transform_3, window_bounds = array<i64: 128, 16>}, {pipeline_mode = #tpu.pipeline_mode<synchronous>, transform_indices = @transform_4, window_bounds = array<i64: 1, 16>}, {pipeline_mode = #tpu.pipeline_mode<synchronous>, transform_indices = @transform_5, window_bounds = array<i64: 16, 128>}, {pipeline_mode = #tpu.pipeline_mode<synchronous>, transform_indices = @transform_6, window_bounds = array<i64: 1, 128>}, {pipeline_mode = #tpu.pipeline_mode<synchronous>, transform_indices = @transform_7, window_bounds = array<i64: 128, 150>}, {pipeline_mode = #tpu.pipeline_mode<synchronous>, transform_indices = @transform_8, window_bounds = array<i64: 1, 150>}, {transform_indices = @transform_9, window_bounds = array<i64: 8, 150>}]} {
    %c0 = arith.constant 0 : index
    %c0_0 = arith.constant 0 : index
    %0 = vector.load %arg1[%c0, %c0_0] : memref<8x150xf32, #tpu.memory_space<vmem>>, vector<8x150xf32>
    %c0_1 = arith.constant 0 : index
    %c0_2 = arith.constant 0 : index
    %1 = vector.load %arg2[%c0_1, %c0_2] : memref<150x128xf32, #tpu.memory_space<vmem>>, vector<150x128xf32>
    %cst = arith.constant dense<0.000000e+00> : vector<8x128xf32>
    %2 = tpu.matmul %0, %1, %cst {dimension_numbers = #tpu.dot_dimension_numbers<[1], [0], [0], [1], [0, 0, 1, 1], [], []>} : vector<8x150xf32>, vector<150x128xf32>, vector<8x128xf32> -> vector<8x128xf32>
    %c0_3 = arith.constant 0 : index
    %c0_4 = arith.constant 0 : index
    %3 = vector.load %arg3[%c0_3, %c0_4] : memref<1x128xf32, #tpu.memory_space<vmem>>, vector<1x128xf32>
    %4 = vector.broadcast %3 : vector<1x128xf32> to vector<8x128xf32>
    %5 = arith.addf %2, %4 : vector<8x128xf32>
    %cst_5 = arith.constant 0.000000e+00 : f32
    %6 = vector.broadcast %cst_5 : f32 to vector<8x128xf32>
    %7 = arith.maximumf %5, %6 : vector<8x128xf32>
    %c0_6 = arith.constant 0 : index
    %c0_7 = arith.constant 0 : index
    %8 = vector.load %arg4[%c0_6, %c0_7] : memref<128x16xf32, #tpu.memory_space<vmem>>, vector<128x16xf32>
    %cst_8 = arith.constant dense<0.000000e+00> : vector<8x16xf32>
    %9 = tpu.matmul %7, %8, %cst_8 {dimension_numbers = #tpu.dot_dimension_numbers<[1], [0], [0], [1], [0, 0, 1, 1], [], []>} : vector<8x128xf32>, vector<128x16xf32>, vector<8x16xf32> -> vector<8x16xf32>
    %c0_9 = arith.constant 0 : index
    %c0_10 = arith.constant 0 : index
    %10 = vector.load %arg5[%c0_9, %c0_10] : memref<1x16xf32, #tpu.memory_space<vmem>>, vector<1x16xf32>
    %11 = vector.broadcast %10 : vector<1x16xf32> to vector<8x16xf32>
    %12 = arith.addf %9, %11 : vector<8x16xf32>
    %cst_11 = arith.constant 0.000000e+00 : f32
    %13 = vector.broadcast %cst_11 : f32 to vector<8x16xf32>
    %14 = arith.maximumf %12, %13 : vector<8x16xf32>
    %c0_12 = arith.constant 0 : index
    %c0_13 = arith.constant 0 : index
    %15 = vector.load %arg6[%c0_12, %c0_13] : memref<16x128xf32, #tpu.memory_space<vmem>>, vector<16x128xf32>
    %cst_14 = arith.constant dense<0.000000e+00> : vector<8x128xf32>
    %16 = tpu.matmul %14, %15, %cst_14 {dimension_numbers = #tpu.dot_dimension_numbers<[1], [0], [0], [1], [0, 0, 1, 1], [], []>} : vector<8x16xf32>, vector<16x128xf32>, vector<8x128xf32> -> vector<8x128xf32>
    %c0_15 = arith.constant 0 : index
    %c0_16 = arith.constant 0 : index
    %17 = vector.load %arg7[%c0_15, %c0_16] : memref<1x128xf32, #tpu.memory_space<vmem>>, vector<1x128xf32>
    %18 = vector.broadcast %17 : vector<1x128xf32> to vector<8x128xf32>
    %19 = arith.addf %16, %18 : vector<8x128xf32>
    %cst_17 = arith.constant 0.000000e+00 : f32
    %20 = vector.broadcast %cst_17 : f32 to vector<8x128xf32>
    %21 = arith.maximumf %19, %20 : vector<8x128xf32>
    %c0_18 = arith.constant 0 : index
    %c0_19 = arith.constant 0 : index
    %22 = vector.load %arg8[%c0_18, %c0_19] : memref<128x150xf32, #tpu.memory_space<vmem>>, vector<128x150xf32>
    %cst_20 = arith.constant dense<0.000000e+00> : vector<8x150xf32>
    %23 = tpu.matmul %21, %22, %cst_20 {dimension_numbers = #tpu.dot_dimension_numbers<[1], [0], [0], [1], [0, 0, 1, 1], [], []>} : vector<8x128xf32>, vector<128x150xf32>, vector<8x150xf32> -> vector<8x150xf32>
    %c0_21 = arith.constant 0 : index
    %c0_22 = arith.constant 0 : index
    %24 = vector.load %arg9[%c0_21, %c0_22] : memref<1x150xf32, #tpu.memory_space<vmem>>, vector<1x150xf32>
    %25 = vector.broadcast %24 : vector<1x150xf32> to vector<8x150xf32>
    %26 = arith.addf %23, %25 : vector<8x150xf32>
    %27 = arith.negf %26 : vector<8x150xf32>
    %28 = math.exp %27 : vector<8x150xf32>
    %cst_23 = arith.constant 1.000000e+00 : f32
    %29 = vector.broadcast %cst_23 : f32 to vector<8x150xf32>
    %30 = arith.addf %29, %28 : vector<8x150xf32>
    %31 = arith.divf %29, %30 : vector<8x150xf32>
    %c0_24 = arith.constant 0 : index
    %c0_25 = arith.constant 0 : index
    %32 = vector.load %arg10[%c0_24, %c0_25] : memref<8x150xf32, #tpu.memory_space<vmem>>, vector<8x150xf32>
    tpu.vector_store %arg10[%c0_24, %c0_25], %31 {strides = array<i32>} : memref<8x150xf32, #tpu.memory_space<vmem>>, vector<8x150xf32>,
    return
  }
  func.func @transform_0(%arg0: i32) -> (i32, i32) {
    %c0_i32 = arith.constant 0 : i32
    %c0_i32_0 = arith.constant 0 : i32
    return %arg0, %c0_i32 : i32, i32
  }
  func.func @transform_1(%arg0: i32) -> (i32, i32) {
    %c0_i32 = arith.constant 0 : i32
    %c0_i32_0 = arith.constant 0 : i32
    %c0_i32_1 = arith.constant 0 : i32
    return %c0_i32, %c0_i32_0 : i32, i32
  }
  func.func @transform_2(%arg0: i32) -> (i32, i32) {
    %c0_i32 = arith.constant 0 : i32
    %c0_i32_0 = arith.constant 0 : i32
    %c0_i32_1 = arith.constant 0 : i32
    return %c0_i32, %c0_i32_0 : i32, i32
  }
  func.func @transform_3(%arg0: i32) -> (i32, i32) {
    %c0_i32 = arith.constant 0 : i32
    %c0_i32_0 = arith.constant 0 : i32
    %c0_i32_1 = arith.constant 0 : i32
    return %c0_i32, %c0_i32_0 : i32, i32
  }
  func.func @transform_4(%arg0: i32) -> (i32, i32) {
    %c0_i32 = arith.constant 0 : i32
    %c0_i32_0 = arith.constant 0 : i32
    %c0_i32_1 = arith.constant 0 : i32
    return %c0_i32, %c0_i32_0 : i32, i32
  }
  func.func @transform_5(%arg0: i32) -> (i32, i32) {
    %c0_i32 = arith.constant 0 : i32
    %c0_i32_0 = arith.constant 0 : i32
    %c0_i32_1 = arith.constant 0 : i32
    return %c0_i32, %c0_i32_0 : i32, i32
  }
  func.func @transform_6(%arg0: i32) -> (i32, i32) {
    %c0_i32 = arith.constant 0 : i32
    %c0_i32_0 = arith.constant 0 : i32
    %c0_i32_1 = arith.constant 0 : i32
    return %c0_i32, %c0_i32_0 : i32, i32
  }
  func.func @transform_7(%arg0: i32) -> (i32, i32) {
    %c0_i32 = arith.constant 0 : i32
    %c0_i32_0 = arith.constant 0 : i32
    %c0_i32_1 = arith.constant 0 : i32
    return %c0_i32, %c0_i32_0 : i32, i32
  }
  func.func @transform_8(%arg0: i32) -> (i32, i32) {
    %c0_i32 = arith.constant 0 : i32
    %c0_i32_0 = arith.constant 0 : i32
    %c0_i32_1 = arith.constant 0 : i32
    return %c0_i32, %c0_i32_0 : i32, i32
  }
  func.func @transform_9(%arg0: i32) -> (i32, i32) {
    %c0_i32 = arith.constant 0 : i32
    %c0_i32_0 = arith.constant 0 : i32
    return %arg0, %c0_i32 : i32, i32
  }
}

</mosaic_0001>

<bundles_post_ra>
// kernel: tpu_custom_call.1
= control target key start
LH: loop header
LB: loop body
LE: loop exit
PB: predicated region body
PF: predicated region fallthrough
CT: control target
= control target key end

     0   :  { %vm62_vm0 = vcmask 1045504   ;;  %vm58_vm1 = vcmask 179200   ;;  %s637_s0 = inlined_call_operand.vmem [shape: f32[8,150], index: 0, kind: input, shape index: {}]   ;;  %s638_s1 = inlined_call_operand.vmem [shape: f32[150,128], index: 1, kind: input, shape index: {}]   ;;  %s639_s2 = inlined_call_operand.vmem [shape: f32[1,128], index: 2, kind: input, shape index: {}]   ;;  %s640_s3 = inlined_call_operand.vmem [shape: f32[128,16], index: 3, kind: input, shape index: {}]   ;;  %s641_s4 = inlined_call_operand.vmem [shape: f32[1,16], index: 4, kind: input, shape index: {}]   ;;  %s642_s5 = inlined_call_operand.vmem [shape: f32[16,128], index: 5, kind: input, shape index: {}]   ;;  %s643_s6 = inlined_call_operand.vmem [shape: f32[1,128], index: 6, kind: input, shape index: {}]   ;;  %s644_s7 = inlined_call_operand.vmem [shape: f32[128,150], index: 7, kind: input, shape index: {}]   ;;  %s645_s8 = inlined_call_operand.vmem [shape: f32[1,150], index: 8, kind: input, shape index: {}]   ;;  %s646_s9 = inlined_call_operand.hbm [shape: f32[8,150], index: 9, kind: output, shape index: {}]  }
   0x1   :  { %v50_v0 = vld [vmem:[%s638_s1 + $0x78] sm:$0xff]  ;;  %v49_v1 = vld [vmem:[%s638_s1 + $0x70] sm:$0xff]  ;;  %v48_v2 = vld [vmem:[%s638_s1 + $0x68] sm:$0xff] }
   0x2   :  { %66 = vmatpush.msra.mxu0 %v50_v0  ;;  %v47_v3 = vld [vmem:[%s638_s1 + $0x60] sm:$0xff]  ;;  %v53_v4 = vld [vmem:[%s638_s1 + $0x90] sm:$0x3f]  ;;  %v52_v5 = vld [vmem:[%s638_s1 + $0x88] sm:$0xff] }
   0x3   :  { %v46_v6 = vld [vmem:[%s638_s1 + $0x58] sm:$0xff]  ;;  %313 = vmatpush.msk.msra.mxu1 %vm62_vm0, %v53_v4  ;;  %v51_v7 = vld [vmem:[%s638_s1 + $0x80] sm:$0xff]  ;;  %v121_v9 = vld [vmem:[%s640_s3 + $0x70] sm:$0xff] }
   0x4   :  { %67 = vmatpush.msra.mxu0 %v49_v1  ;;  %v122_v8 = vld [vmem:[%s640_s3 + $0x78] sm:$0xff]  ;;  %v45_v10 = vld [vmem:[%s638_s1 + $0x50] sm:$0xff]  ;;  %v34_v11 = vld [vmem:[%s637_s0 + $0x8] sm:$0xff] }
   0x5   :  { %100 = vmatpush.msra.mxu1 %v52_v5  ;;  %127 = vmatpush.msra.mxu2 %v122_v8  ;;  %v120_v12 = vld [vmem:[%s640_s3 + $0x68] sm:$0xff]  ;;  %v119_v14 = vld [vmem:[%s640_s3 + $0x60] sm:$0xff] }
   0x6   :  { %68 = vmatpush.msra.mxu0 %v48_v2  ;;  %v44_v13 = vld [vmem:[%s638_s1 + $0x48] sm:$0xff]  ;;  %v43_v15 = vld [vmem:[%s638_s1 + $0x40] sm:$0xff] }
   0x7   :  { %101 = vmatpush.msra.mxu1 %v51_v7  ;;  %128 = vmatpush.msra.mxu2 %v121_v9 }
   0x8   :  { %69 = vmatpush.msra.mxu0 %v47_v3  ;;  %314 = vmatmul.msk.f32.vlgmr.msra.gmra.mxu1 %vm58_vm1, %v34_v11 }
   0x9   :  { %129 = vmatpush.msra.mxu2 %v120_v12 }
   0xa   :  { %70 = vmatpush.msra.mxu0 %v46_v6 }
   0xc   :  { %71 = vmatpush.msra.mxu0 %v45_v10 }
   0xd   :  { %14 = vsyncpa [#allocation3], 0  ;;  %v118_v16 = vld [vmem:[%s640_s3 + $0x58] sm:$0xff]  ;;  %130 = vmatpush.msra.mxu2 %v119_v14  ;;  %v117_v18 = vld [vmem:[%s640_s3 + $0x50] sm:$0xff]  ;;  %vm154_vm2 = vcmask 130048   ;;  %s304_s17 = sshll.u32 %s646_s9, 4  ;;  %s305_s17 = int_to_ptr.hbm [resolvable:$true] %s304_s17 }
   0xe   :  { %72 = vmatpush.msra.mxu0 %v44_v13  ;;  %v42_v17 = vld [vmem:[%s638_s1 + $0x38] sm:$0xff]  ;;  %v41_v19 = vld [vmem:[%s638_s1 + $0x30] sm:$0xff]  ;;  %v116_v20 = vld [vmem:[%s640_s3 + $0x48] sm:$0xff] }
   0xf   :  { %131 = vmatpush.msra.mxu2 %v118_v16  ;;  %v40_v21 = vld [vmem:[%s638_s1 + $0x28] sm:$0xff]  ;;  %v115_v22 = vld [vmem:[%s640_s3 + $0x40] sm:$0xff]  ;;  %v114_v24 = vld [vmem:[%s640_s3 + $0x38] sm:$0xff] }
  0x10   :  { %73 = vmatpush.msra.mxu0 %v43_v15  ;;  %v39_v23 = vld [vmem:[%s638_s1 + $0x20] sm:$0xff]  ;;  %v38_v25 = vld [vmem:[%s638_s1 + $0x18] sm:$0xff]  ;;  %v113_v26 = vld [vmem:[%s640_s3 + $0x30] sm:$0xff] }
  0x11   :  { %132 = vmatpush.msra.mxu2 %v117_v18  ;;  %v37_v27 = vld [vmem:[%s638_s1 + $0x10] sm:$0xff]  ;;  %v112_v28 = vld [vmem:[%s640_s3 + $0x28] sm:$0xff]  ;;  %v111_v30 = vld [vmem:[%s640_s3 + $0x20] sm:$0xff] }
  0x12   :  { %74 = vmatpush.msra.mxu0 %v42_v17  ;;  %v36_v29 = vld [vmem:[%s638_s1 + $0x8] sm:$0xff]  ;;  %v35_v31 = vld [vmem:[%s638_s1] sm:$0xff]  ;;  %v110_v33 = vld [vmem:[%s640_s3 + $0x18] sm:$0xff] }
  0x13   :  { %133 = vmatpush.msra.mxu2 %v116_v20  ;;  %v33_v32 = vld [vmem:[%s637_s0] sm:$0xff]  ;;  %v109_v34 = vld [vmem:[%s640_s3 + $0x10] sm:$0xff]  ;;  %v108_v35 = vld [vmem:[%s640_s3 + $0x8] sm:$0xff] }
  0x14   :  { %75 = vmatpush.msra.mxu0 %v41_v19  ;;  %v107_v36 = vld [vmem:[%s640_s3] sm:$0xff]  ;;  %v149_v43 = vld [vmem:[%s642_s5 + $0x8] sm:$0xff]  ;;  %v209_v45 = vld [vmem:[%s644_s7 + $0xf0] sm:$0xff] }
  0x15   :  { %134 = vmatpush.msra.mxu2 %v115_v22  ;;  %v319_v37 = vld [vmem:[%s639_s2] ss:$0 sm:$0xff]  ;;  %172 = vmatpush.msra.mxu3 %v149_v43  ;;  %v210_v46 = vld [vmem:[%s644_s7 + $0xf8] sm:$0xff]  ;;  %v208_v48 = vld [vmem:[%s644_s7 + $0xe8] sm:$0xff] }
  0x16   :  { %76 = vmatpush.msra.mxu0 %v40_v21  ;;  %v148_v44 = vld [vmem:[%s642_s5] sm:$0xff]  ;;  %237 = vmatpush.msrb.mxu1 %v210_v46  ;;  %v205_v49 = vld [vmem:[%s644_s7 + $0xd0] sm:$0xff]  ;;  %v206_v50 = vld [vmem:[%s644_s7 + $0xd8] sm:$0xff] }
  0x17   :  { %135 = vmatpush.msra.mxu2 %v114_v24  ;;  %173 = vmatpush.msra.mxu3 %v148_v44  ;;  %v207_v47 = vld [vmem:[%s644_s7 + $0xe0] sm:$0xff]  ;;  %v204_v52 = vld [vmem:[%s644_s7 + $0xc8] sm:$0xff]  ;;  %v201_v53 = vld [vmem:[%s644_s7 + $0xb0] sm:$0xff] }
  0x18   :  { %77 = vmatpush.msra.mxu0 %v39_v23  ;;  %238 = vmatpush.msrb.mxu1 %v208_v48  ;;  %v203_v51 = vld [vmem:[%s644_s7 + $0xc0] sm:$0xff]  ;;  %v202_v54 = vld [vmem:[%s644_s7 + $0xb8] sm:$0xff]  ;;  %v200_v56 = vld [vmem:[%s644_s7 + $0xa8] sm:$0xff] }
  0x19   :  { %136 = vmatpush.msra.mxu2 %v113_v26  ;;  %217 = vmatpush.msrb.mxu3 %v209_v45  ;;  %v199_v55 = vld [vmem:[%s644_s7 + $0xa0] sm:$0xff]  ;;  %v197_v57 = vld [vmem:[%s644_s7 + $0x90] sm:$0xff]  ;;  %v198_v58 = vld [vmem:[%s644_s7 + $0x98] sm:$0xff] }
  0x1a   :  { %78 = vmatpush.msra.mxu0 %v38_v25  ;;  %239 = vmatpush.msrb.mxu1 %v206_v50  ;;  %v195_v59 = vld [vmem:[%s644_s7 + $0x80] sm:$0xff]  ;;  %v196_v60 = vld [vmem:[%s644_s7 + $0x88] sm:$0xff]  ;;  %v193_v61 = vld [vmem:[%s644_s7 + $0x70] sm:$0xff] }
  0x1b   :  { %137 = vmatpush.msra.mxu2 %v112_v28  ;;  %218 = vmatpush.msrb.mxu3 %v207_v47  ;;  %v194_v62 = vld [vmem:[%s644_s7 + $0x78] sm:$0xff]  ;;  %v191_v63 = vld [vmem:[%s644_s7 + $0x60] sm:$0xff]  ;;  %v192_v0 = vld [vmem:[%s644_s7 + $0x68] sm:$0xff] }
  0x1c   :  { %79 = vmatpush.msra.mxu0 %v37_v27  ;;  %240 = vmatpush.msrb.mxu1 %v204_v52  ;;  %v189_v1 = vld [vmem:[%s644_s7 + $0x50] sm:$0xff]  ;;  %v190_v2 = vld [vmem:[%s644_s7 + $0x58] sm:$0xff]  ;;  %v187_v3 = vld [vmem:[%s644_s7 + $0x40] sm:$0xff] }
  0x1d   :  { %138 = vmatpush.msra.mxu2 %v111_v30  ;;  %219 = vmatpush.msrb.mxu3 %v205_v49  ;;  %v188_v4 = vld [vmem:[%s644_s7 + $0x48] sm:$0xff]  ;;  %v185_v5 = vld [vmem:[%s644_s7 + $0x30] sm:$0xff]  ;;  %v186_v6 = vld [vmem:[%s644_s7 + $0x38] sm:$0xff] }
  0x1e   :  { %80 = vmatpush.msra.mxu0 %v36_v29  ;;  %241 = vmatpush.msrb.mxu1 %v202_v54  ;;  %v320_v7 = vld [vmem:[%s641_s4] ss:$0 sm:$0xff]  ;;  %v184_v12 = vld [vmem:[%s644_s7 + $0x28] sm:$0xff]  ;;  %v181_v13 = vld [vmem:[%s644_s7 + $0x10] sm:$0xff] }
  0x1f   :  { %139 = vmatpush.msra.mxu2 %v110_v33  ;;  %220 = vmatpush.msrb.mxu3 %v203_v51  ;;  %v183_v11 = vld [vmem:[%s644_s7 + $0x20] sm:$0xff]  ;;  %v182_v14 = vld [vmem:[%s644_s7 + $0x18] sm:$0xff]  ;;  %v180_v16 = vld [vmem:[%s644_s7 + $0x8] sm:$0xff] }
  0x20   :  { %81 = vmatpush.msra.mxu0 %v35_v31  ;;  %242 = vmatpush.msrb.mxu1 %v200_v56  ;;  %v179_v15 = vld [vmem:[%s644_s7] sm:$0xff] }
  0x21   :  { %82 = vmatmul.f32.vlgmr.msra.gmra.mxu0 %v33_v32  ;;  %140 = vmatpush.msra.mxu2 %v109_v34  ;;  %v321_v17 = vld [vmem:[%s643_s6] ss:$0 sm:$0xff]  ;;  %s356_s6 = smov [#allocation2]  }
  0x22   :  { %221 = vmatpush.msrb.mxu3 %v201_v53  ;;  %243 = vmatpush.msrb.mxu1 %v198_v58  ;;  %v211_v21 = vld [vmem:[%s645_s8] sm:$0x3]  ;;  %s302_s7 = sshll.u32 %s356_s6, 4  ;;  %s303_s7 = int_to_ptr.vmem [resolvable:$true] %s302_s7 }
  0x23   :  { %141 = vmatpush.msra.mxu2 %v108_v35  ;;  %v214_v22 = vperm.slane %v211_v21, 1  ;;  %v213_v26 = vperm.slane %v211_v21, 0 }
  0x24   :  { %222 = vmatpush.msrb.mxu3 %v199_v55  ;;  %244 = vmatpush.msrb.mxu1 %v196_v60 }
  0x25   :  { %142 = vmatpush.msra.mxu2 %v107_v36 }
  0x26   :  { %223 = vmatpush.msrb.mxu3 %v197_v57  ;;  %245 = vmatpush.msrb.mxu1 %v194_v62 }
  0x28   :  { %224 = vmatpush.msrb.mxu3 %v195_v59  ;;  %246 = vmatpush.msrb.mxu1 %v192_v0 }
  0x2a   :  { %225 = vmatpush.msrb.mxu3 %v193_v61  ;;  %247 = vmatpush.msrb.mxu1 %v190_v2 }
  0x2c   :  { %226 = vmatpush.msrb.mxu3 %v191_v63  ;;  %248 = vmatpush.msrb.mxu1 %v188_v4 }
  0x2e   :  { %227 = vmatpush.msrb.mxu3 %v189_v1  ;;  %249 = vmatpush.msrb.mxu1 %v186_v6 }
  0x30   :  { %228 = vmatpush.msrb.mxu3 %v187_v3  ;;  %250 = vmatpush.msrb.mxu1 %v184_v12 }
  0x32   :  { %229 = vmatpush.msrb.mxu3 %v185_v5  ;;  %251 = vmatpush.msrb.mxu1 %v182_v14 }
  0x34   :  { %230 = vmatpush.msrb.mxu3 %v183_v11  ;;  %252 = vmatpush.msrb.mxu1 %v180_v16 }
  0x36   :  { %231 = vmatpush.msrb.mxu3 %v181_v13 }
  0x38   :  { %232 = vmatpush.msrb.mxu3 %v179_v15 }
  0x85   :  { %v103_v39 = vpop.f32.mrf.mxu1 }
  0x9e   :  { %v83_v38 = vpop.f32.mrf.mxu0 }
  0x9f   :  { %v84_v40 = vadd.f32 %v319_v37, %v83_v38 }
  0xa1   :  { %v104_v41 = vadd.f32 %v103_v39, %v84_v40 }
  0xa3   :  { %v106_v42 = vmax.f32 %v104_v41, 0.0 }
  0xa5   :  { %143 = vmatmul.f32.vlgmr.msra.gmra.mxu2 %v106_v42 }
 0x128   :  { %v144_v8 = vpop.f32.mrf.mxu2 }
 0x129   :  { %v145_v9 = vadd.f32 %v320_v7, %v144_v8 }
 0x12b   :  { %v147_v10 = vmax.f32 %v145_v9, 0.0 }
 0x12d   :  { %315 = vmatmul.msk.f32.vlgmr.msra.gmra.mxu3 %vm154_vm2, %v147_v10 }
 0x1b0   :  { %v175_v18 = vpop.f32.mrf.mxu3 }
 0x1b1   :  { %v176_v19 = vadd.f32 %v321_v17, %v175_v18 }
 0x1b3   :  { %v178_v20 = vmax.f32 %v176_v19, 0.0 }
 0x1b5   :  { %233 = vmatmul.f32.vlgmr.msrb.gmra.mxu3 %v178_v20  ;;  %253 = vmatmul.f32.vlgmr.msrb.gmra.mxu1 %v178_v20 }
 0x232   :  { %v254_v23 = vpop.f32.mrf.mxu1 }
 0x233   :  { %v255_v24 = vadd.f32 %v254_v23, %v214_v22 }
 0x235   :  { %v317_v25 = vmul.f32 -1.442695, %v255_v24 }
 0x237   :  { %322 = vpow2.f32 %v317_v25 }
 0x238   :  { %v234_v27 = vpop.f32.mrf.mxu3 }
 0x239   :  { %v235_v28 = vadd.f32 %v234_v27, %v213_v26 }
 0x23b   :  { %v316_v29 = vmul.f32 -1.442695, %v235_v28 }
 0x23d   :  { %v323_v30 = vpop.eup %322  ;;  %324 = vpow2.f32 %v316_v29 }
 0x23e   :  { %v264_v31 = vadd.f32 1.0, %v323_v30 }
 0x240   :  { %326 = vrcp.f32 %v264_v31  ;;  %v291_v37 = vand.u32 2147483648, %v264_v31  ;;  %v289_v39 = vand.u32 2147483647, %v264_v31  ;;  %vm285_vm4 = vweird.f32 %v264_v31 }
 0x242   :  { %v292_v43 = vor.u32 1.1754944e-38, %v291_v37  ;;  %vm290_vm6 = vcmp.eq.f32.partialorder %v289_v39, 8.507059e+37 }
 0x243   :  { %v325_v32 = vpop.eup %324 }
 0x244   :  { %v263_v33 = vadd.f32 1.0, %v325_v32 }
 0x246   :  { %v327_v34 = vpop.eup %326  ;;  %328 = vrcp.f32 %v263_v33  ;;  %v276_v46 = vand.u32 2147483648, %v263_v33  ;;  %v274_v49 = vand.u32 2147483647, %v263_v33  ;;  %vm270_vm8 = vweird.f32 %v263_v33 }
 0x247   :  { %v281_v35 = vmul.f32 %v327_v34, %v264_v31  ;;  %vm286_vm3 = vweird.f32 %v327_v34 }
 0x248   :  { %vm287_vm5 = vmor %vm285_vm4, %vm286_vm3  ;;  %v277_v51 = vor.u32 1.1754944e-38, %v276_v46  ;;  %vm275_vm10 = vcmp.eq.f32.partialorder %v274_v49, 8.507059e+37 }
 0x249   :  { %v282_v36 = vsub.f32 1.0, %v281_v35 }
 0x24b   :  { %v283_v38 = vmul.f32 %v327_v34, %v282_v36 }
 0x24c   :  { %v329_v40 = vpop.eup %328 }
 0x24d   :  { %v266_v41 = vmul.f32 %v329_v40, %v263_v33  ;;  %v284_v42 = vadd.f32 %v327_v34, %v283_v38  ;;  %vm271_vm7 = vweird.f32 %v329_v40 }
 0x24e   :  { %vm272_vm9 = vmor %vm270_vm8, %vm271_vm7 }
 0x24f   :  { %v267_v44 = vsub.f32 1.0, %v266_v41  ;;  %v288_v45 = vsel %vm287_vm5, %v327_v34, %v284_v42 }
 0x250   :  { %v293_v47 = vsel %vm290_vm6, %v292_v43, %v288_v45 }
 0x251   :  { %v268_v48 = vmul.f32 %v329_v40, %v267_v44  ;;  %296 = vst.msk [vmem:[#allocation2 + $0x8] sm:$0xff] %vm58_vm1, %v293_v47 }
 0x253   :  { %v269_v50 = vadd.f32 %v329_v40, %v268_v48 }
 0x255   :  { %v273_v52 = vsel %vm272_vm9, %v329_v40, %v269_v50 }
 0x256   :  { %v278_v53 = vsel %vm275_vm10, %v277_v51, %v273_v52 }
 0x257   :  { %295 = vst [vmem:[#allocation2] sm:$0xff] %v278_v53 }
 0x258   :  { %307 = dma.vmem_to_hbm [thread:$0]  %s303_s7, 256, %s305_s17, [#allocation3]  }
 0x259   :  { %354 = dma.done.wait [#allocation3], 256  }
 0x25a   :  { %355 = vsyncadd [#allocation3], 4294967040 }
 0x25b   :  { %312 = vsyncpa [#allocation3], 1 }

</bundles_post_ra>
